<compile_context>
chip_gen: v7x
topology: tpu7x:2x2x1
jax: 0.10.0
libtpu: 0.0.40
codegen_flags: <defaults>
</compile_context>

<pallas_src>
import functools
import numpy as np
import jax
import jax.numpy as jnp
from jax.experimental import pallas as pl
from jax.experimental.pallas import tpu as pltpu

BN_EPS = 1e-5
SINGLE_K_MAX = 1024           # K above this (and a multiple of 128) is K-pipelined


def _vmem_limit_bytes():
    # Stay well under v7x's 64 MiB physical VMEM per TensorCore; allow more
    # headroom on v5e / v6e (128 MiB).
    try:
        cap = int(pltpu.get_tpu_info().vmem_capacity_bytes)
        return min((cap * 3) // 4, 96 * 1024 * 1024)
    except Exception:
        return 48 * 1024 * 1024


VMEM_LIMIT = _vmem_limit_bytes()
AB_BUDGET = max(8 * 1024 * 1024, VMEM_LIMIT // 4)   # budget for pipelined matmul tiles


# ----------------------------------------------------------------------------
# Pallas kernels
# ----------------------------------------------------------------------------
def mm_single_kernel(a_ref, b_ref, s_ref, o_ref, *, relu):
    """Single K-step: out = act((A @ B) * scale + bias)."""
    acc = jnp.dot(a_ref[...], b_ref[...], preferred_element_type=jnp.float32)
    y = acc * s_ref[0:1, :] + s_ref[1:2, :]
    if relu:
        y = jnp.maximum(y, 0.0)
    o_ref[...] = y.astype(o_ref.dtype)


def mm_single_res_kernel(a_ref, b_ref, s_ref, r_ref, o_ref, *, relu):
    """Single K-step with residual: out = act((A @ B) * scale + bias + residual)."""
    acc = jnp.dot(a_ref[...], b_ref[...], preferred_element_type=jnp.float32)
    y = acc * s_ref[0:1, :] + s_ref[1:2, :] + r_ref[...].astype(jnp.float32)
    if relu:
        y = jnp.maximum(y, 0.0)
    o_ref[...] = y.astype(o_ref.dtype)


def mm_acc_kernel(a_ref, b_ref, s_ref, o_ref, acc_ref, *, relu):
    """K-tiled accumulation: out = act((A @ B) * scale + bias)."""
    @pl.when(pl.program_id(2) == 0)
    def _():
        acc_ref[...] = jnp.zeros_like(acc_ref)

    acc_ref[...] += jnp.dot(a_ref[...], b_ref[...],
                            preferred_element_type=jnp.float32)

    @pl.when(pl.program_id(2) == pl.num_programs(2) - 1)
    def _():
        y = acc_ref[...] * s_ref[0:1, :] + s_ref[1:2, :]
        if relu:
            y = jnp.maximum(y, 0.0)
        o_ref[...] = y.astype(o_ref.dtype)


def mm_acc_res_kernel(a_ref, b_ref, s_ref, r_ref, o_ref, acc_ref, *, relu):
    """K-tiled accumulation with residual add in the epilogue."""
    @pl.when(pl.program_id(2) == 0)
    def _():
        acc_ref[...] = jnp.zeros_like(acc_ref)

    acc_ref[...] += jnp.dot(a_ref[...], b_ref[...],
                            preferred_element_type=jnp.float32)

    @pl.when(pl.program_id(2) == pl.num_programs(2) - 1)
    def _():
        y = (acc_ref[...] * s_ref[0:1, :] + s_ref[1:2, :]
             + r_ref[...].astype(jnp.float32))
        if relu:
            y = jnp.maximum(y, 0.0)
        o_ref[...] = y.astype(o_ref.dtype)


def _max_axis0_kernel(x_ref, o_ref):   # (9, R, L) -> (R, L)   (3x3 max pool)
    o_ref[...] = jnp.max(x_ref[...], axis=0)


def _max_axis1_kernel(x_ref, o_ref):   # (N, HW, C) -> (N, C)  (AdaptiveMaxPool2d(1))
    o_ref[...] = jnp.max(x_ref[...], axis=1)


# ----------------------------------------------------------------------------
# Tile selection + Pallas wrappers
# ----------------------------------------------------------------------------
def _pick_tiles(M, Nc):
    """Pick (tm, tn) such that tiles are lane/sublane friendly and the (i, j) parallel
    grid has >= 2 tiles whenever possible (keeps both v7x TensorCores busy)."""
    tm = next((t for t in (512, 256, 128, 64, 32, 16) if M % t == 0), M)
    tn = next((t for t in (512, 256, 128) if Nc % t == 0), Nc)
    if M // tm == 1 and Nc // tn == 1:
        tn_alt = next((t for t in (256, 128) if Nc % t == 0 and Nc // t >= 2), None)
        if tn_alt is not None:
            tn = tn_alt                 # prefer splitting N (keeps MXU M-tile big)
        else:
            tm_alt = next((t for t in (256, 128, 64, 32, 16)
                           if t < tm and M % t == 0), None)
            if tm_alt is not None:
                tm = tm_alt
    return tm, tn


def _pick_tk(K, tm, tn, a_item, out_item, nbuf, has_res, budget):
    """K tile: divisor of K, multiple of 128, sized so the weight stream actually
    pipelines (prefer 4-8 K-steps, accept 3, cap tk at 2304) and the full VMEM
    working set (A/B/out/residual/accumulator/scale buffers) fits the budget."""
    cands = [d for d in range(128, K + 1, 128) if K % d == 0]
    if not cands:
        return K
    fixed = tm * tn * (2 * out_item + 4) + 2 * (2 * tn) * 4
    if has_res:
        fixed += 2 * tm * tn * a_item

    def fits(tk):
        return (2 * tm * tk + nbuf * tk * tn) * a_item + fixed <= budget

    for lo, hi in ((4, 8), (3, 8), (2, 1 << 30)):
        sel = [tk for tk in cands if tk <= 2304 and fits(tk) and lo <= K // tk <= hi]
        if sel:
            return max(sel)
    sel = [tk for tk in cands if fits(tk)]
    return max(sel) if sel else cands[0]


@functools.partial(jax.jit,
                   static_argnames=("relu", "tm", "tn", "tk", "nbuf", "out_dtype"))
def _mm_call(a, b, sb, r, *, relu, tm, tn, tk, nbuf, out_dtype):
    M, K = a.shape
    Nc = b.shape[1]
    ksteps = K // tk
    has_res = r is not None

    if ksteps == 1:
        # No accumulator scratch, no init/finalize branches, 2-D parallel grid.
        grid = (M // tm, Nc // tn)
        a_spec = pl.BlockSpec((tm, K), lambda i, j: (i, 0))
        b_spec = pl.BlockSpec((K, tn), lambda i, j: (0, j))
        s_spec = pl.BlockSpec((2, tn), lambda i, j: (0, j))
        o_spec = pl.BlockSpec((tm, tn), lambda i, j: (i, j))
        r_spec = pl.BlockSpec((tm, tn), lambda i, j: (i, j))
        scratch = []
        semantics = ("parallel", "parallel")
        kern = mm_single_res_kernel if has_res else mm_single_kernel
    else:
        grid = (M // tm, Nc // tn, ksteps)
        a_spec = pl.BlockSpec((tm, tk), lambda i, j, k: (i, k))
        if nbuf > 2:
            # Deeper weight pipeline for tiny-M, weight-bandwidth-bound layers.
            b_spec = pl.BlockSpec((tk, tn), lambda i, j, k: (k, j),
                                  pipeline_mode=pl.Buffered(nbuf))
        else:
            b_spec = pl.BlockSpec((tk, tn), lambda i, j, k: (k, j))
        s_spec = pl.BlockSpec((2, tn), lambda i, j, k: (0, j))
        o_spec = pl.BlockSpec((tm, tn), lambda i, j, k: (i, j))
        r_spec = pl.BlockSpec((tm, tn), lambda i, j, k: (i, j))
        scratch = [pltpu.VMEM((tm, tn), jnp.float32)]
        semantics = ("parallel", "parallel", "arbitrary")
        kern = mm_acc_res_kernel if has_res else mm_acc_kernel

    in_specs = [a_spec, b_spec, s_spec] + ([r_spec] if has_res else [])
    args = (a, b, sb) + ((r,) if has_res else ())
    return pl.pallas_call(
        functools.partial(kern, relu=relu),
        out_shape=jax.ShapeDtypeStruct((M, Nc), out_dtype),
        grid_spec=pltpu.PrefetchScalarGridSpec(
            num_scalar_prefetch=0,
            grid=grid,
            in_specs=in_specs,
            out_specs=o_spec,
            scratch_shapes=scratch,
        ),
        compiler_params=pltpu.CompilerParams(
            dimension_semantics=semantics,
            vmem_limit_bytes=VMEM_LIMIT,
        ),
    )(*args)


def matmul_affine(a, b, sb, *, relu, residual=None,
                  out_dtype=jnp.bfloat16, compute_dtype=jnp.bfloat16):
    """act((a @ b) * sb[0] + sb[1] [+ residual]); matmul in compute_dtype, f32 acc."""
    M, K = a.shape
    Nc = b.shape[1]
    a_item = 2 if compute_dtype == jnp.bfloat16 else 4
    out_item = jnp.dtype(out_dtype).itemsize

    # Keep M a multiple of 16 (bf16 sublane packing) — pads the tiny global-pool matmul.
    pad_unit = 16 if compute_dtype == jnp.bfloat16 else 8
    Mp = ((M + pad_unit - 1) // pad_unit) * pad_unit
    if Mp != M:
        a = jnp.pad(a, ((0, Mp - M), (0, 0)))
        if residual is not None:
            residual = jnp.pad(residual, ((0, Mp - M), (0, 0)))

    tm, tn = _pick_tiles(Mp, Nc)
    if K % 128 != 0 or K <= SINGLE_K_MAX:
        tk, nbuf = K, 2
    else:
        nbuf = 3 if Mp <= 64 else 2
        tk = _pick_tk(K, tm, tn, a_item, out_item, nbuf,
                      residual is not None, AB_BUDGET)
        if K // tk < 3:
            nbuf = 2

    out = _mm_call(a.astype(compute_dtype), b.astype(compute_dtype),
                   sb.astype(jnp.float32), residual,
                   relu=relu, tm=tm, tn=tn, tk=tk, nbuf=nbuf, out_dtype=out_dtype)
    return out[:M] if Mp != M else out


def _im2col(x, k, stride, dilation, padding):
    # TODO(synk): 3x3 taps could be streamed straight from the NHWC activation via a
    #             tap-indexed BlockSpec instead of materializing the k*k-expanded patch
    #             matrix in HBM; kept as bf16 im2col (half the traffic of the f32 version).
    N, H, W, C = x.shape
    Ho = (H + 2 * padding - dilation * (k - 1) - 1) // stride + 1
    Wo = (W + 2 * padding - dilation * (k - 1) - 1) // stride + 1
    if padding:
        x = jnp.pad(x, ((0, 0), (padding, padding), (padding, padding), (0, 0)))
    cols = []
    for i in range(k):
        for j in range(k):
            hi, wj = i * dilation, j * dilation
            cols.append(x[:, hi:hi + stride * (Ho - 1) + 1:stride,
                          wj:wj + stride * (Wo - 1) + 1:stride, :])
    patches = cols[0] if k == 1 else jnp.concatenate(cols, axis=-1)
    return patches.reshape(N * Ho * Wo, k * k * C), (N, Ho, Wo)


def conv_bn_act(x, w, sb, *, k, stride=1, dilation=1, padding=0,
                relu=False, residual=None, out_dtype=jnp.bfloat16):
    N, H, W, C = x.shape
    if (k == 3 and stride == 1 and padding == dilation
            and dilation >= H and dilation >= W):
        # All non-center taps of the dilated 3x3 kernel sample zero padding at every
        # output position, so the conv is exactly a 1x1 conv with the center-tap
        # weight slice (rows [4*C, 5*C)).  No im2col, K drops 9*C -> C.
        a = x.reshape(N * H * W, C)
        r2 = residual.reshape(N * H * W, -1) if residual is not None else None
        out = matmul_affine(a, w[4 * C:5 * C, :], sb, relu=relu, residual=r2,
                            out_dtype=out_dtype)
        return out.reshape(N, H, W, w.shape[1])
    a, (N, Ho, Wo) = _im2col(x, k, stride, dilation, padding)
    if residual is not None:
        residual = residual.reshape(N * Ho * Wo, -1)
    out = matmul_affine(a, w, sb, relu=relu, residual=residual, out_dtype=out_dtype)
    return out.reshape(N, Ho, Wo, w.shape[1])


def maxpool_3x3_s2(x):
    # TODO(synk): the 9 shifted copies are still materialized in HBM (9x traffic for
    #             this small activation); a tap-streaming BlockSpec would remove it
    #             at large resolutions.
    N, H, W, C = x.shape
    Ho = (H + 2 - 3) // 2 + 1
    Wo = (W + 2 - 3) // 2 + 1
    xp = jnp.pad(x, ((0, 0), (1, 1), (1, 1), (0, 0)), constant_values=-np.inf)
    cols = []
    for i in range(3):
        for j in range(3):
            cols.append(xp[:, i:i + 2 * (Ho - 1) + 1:2,
                           j:j + 2 * (Wo - 1) + 1:2, :])
    M = N * Ho * Wo
    stacked = jnp.stack(cols, axis=0).reshape(9, M, C)
    if (M * C) % 128 == 0:                     # lane-dense view -> unmasked stores
        stacked = stacked.reshape(9, (M * C) // 128, 128)
    _, R, L = stacked.shape
    tr = next((t for t in (512, 256, 128, 64, 32, 16, 8) if R % t == 0), R)
    out = pl.pallas_call(
        _max_axis0_kernel,
        out_shape=jax.ShapeDtypeStruct((R, L), x.dtype),
        grid_spec=pltpu.PrefetchScalarGridSpec(
            num_scalar_prefetch=0, grid=(R // tr,),
            in_specs=[pl.BlockSpec((9, tr, L), lambda i: (0, i, 0))],
            out_specs=pl.BlockSpec((tr, L), lambda i: (i, 0))),
        compiler_params=pltpu.CompilerParams(
            dimension_semantics=("parallel",),
            vmem_limit_bytes=VMEM_LIMIT),
    )(stacked)
    return out.reshape(N, Ho, Wo, C)


def global_max_pool(x):
    N, H, W, C = x.shape
    xr = x.reshape(N, H * W, C)
    tc = next((t for t in (512, 256, 128) if C % t == 0), C)
    return pl.pallas_call(
        _max_axis1_kernel,
        out_shape=jax.ShapeDtypeStruct((N, C), x.dtype),
        grid_spec=pltpu.PrefetchScalarGridSpec(
            num_scalar_prefetch=0, grid=(C // tc,),
            in_specs=[pl.BlockSpec((N, H * W, tc), lambda j: (0, 0, j))],
            out_specs=pl.BlockSpec((N, tc), lambda j: (0, j))),
        compiler_params=pltpu.CompilerParams(
            dimension_semantics=("parallel",),
            vmem_limit_bytes=VMEM_LIMIT),
    )(xr)


# ----------------------------------------------------------------------------
# Deterministic parameter construction (mirrors the PyTorch __init__ shapes)
# ----------------------------------------------------------------------------
class ParamGen:
    def __init__(self, key):
        self.key, self.i = key, 0

    def _k(self):
        k = jax.random.fold_in(self.key, self.i)
        self.i += 1
        return k

    def conv(self, k, cin, cout):            # folded weight (k*k*cin, cout), bf16 for MXU
        fan_in = k * k * cin
        w = jax.random.normal(self._k(), (fan_in, cout),
                              jnp.float32) * np.sqrt(1.0 / fan_in)
        return w.astype(jnp.bfloat16)

    def bias(self, cout):
        return jax.random.normal(self._k(), (cout,), jnp.float32) * 0.01


def bn_affine(c):
    # PyTorch BatchNorm2d default init, eval-mode statistics folded to (2, c) [scale; bias].
    gamma, beta = jnp.ones((c,), jnp.float32), jnp.zeros((c,), jnp.float32)
    mean, var = jnp.zeros((c,), jnp.float32), jnp.ones((c,), jnp.float32)
    scale = gamma / jnp.sqrt(var + BN_EPS)
    return jnp.stack([scale, beta - mean * scale])


def fold_conv_bias(sb, cb):
    # conv bias folded through the BN affine: bias' = bn_bias + bn_scale * cb
    return sb.at[1, :].add(sb[0, :] * cb)


def identity_affine(cb):
    return jnp.stack([jnp.ones_like(cb), cb])


def make_bottleneck(pg, inplanes, planes, stride=1, rate=1, downsample=False):
    p = dict(stride=stride, rate=rate)
    p["w1"], p["sb1"] = pg.conv(1, inplanes, planes), bn_affine(planes)
    p["w2"], p["sb2"] = pg.conv(3, planes, planes), bn_affine(planes)
    p["w3"], p["sb3"] = pg.conv(1, planes, planes * 4), bn_affine(planes * 4)
    if downsample:
        p["wd"], p["sbd"] = pg.conv(1, inplanes, planes * 4), bn_affine(planes * 4)
    return p


def make_resnet(pg, layers=(3, 4, 23)):
    P, inplanes = {}, 64
    P["conv1_w"] = pg.conv(7, 3, 64)
    P["bn1"] = bn_affine(64)

    def make_layer(planes, blocks, stride, rate):
        nonlocal inplanes
        ds = stride != 1 or inplanes != planes * 4
        blks = [make_bottleneck(pg, inplanes, planes, stride, rate, ds)]
        inplanes = planes * 4
        for _ in range(1, blocks):
            blks.append(make_bottleneck(pg, inplanes, planes, 1, 1, False))
        return blks

    def make_mg(planes, blocks=(1, 2, 4), stride=1, rate=2):
        nonlocal inplanes
        ds = stride != 1 or inplanes != planes * 4
        blks = [make_bottleneck(pg, inplanes, planes, stride, blocks[0] * rate, ds)]
        inplanes = planes * 4
        for i in range(1, len(blocks)):
            blks.append(make_bottleneck(pg, inplanes, planes, 1, blocks[i] * rate, False))
        return blks

    P["layer1"] = make_layer(64, layers[0], 1, 1)
    P["layer2"] = make_layer(128, layers[1], 2, 1)
    P["layer3"] = make_layer(256, layers[2], 2, 1)
    P["layer4"] = make_mg(512)
    return P


def make_deeplab(pg, num_classes):
    P = {"resnet": make_resnet(pg)}
    aspps = []
    for r in (1, 6, 12, 18):
        w, cb = pg.conv(3, 2048, 256), pg.bias(256)
        aspps.append(dict(w=w, sb=fold_conv_bias(bn_affine(256), cb), rate=r))
    P["aspp"] = aspps
    # Pre-sliced center-tap (tap index 4) weights of the dilated branches, concatenated
    # along N: valid replacement for the full 3x3 dilated convs whenever dilation >=
    # feature H,W (all non-center taps then read zero padding).  Fusing the 3 branches
    # into one matmul gives a single continuous weight stream and a lane-dense 768-wide
    # output.
    cin = 2048
    dil = [ap for ap in aspps if ap["rate"] > 1]
    P["aspp_center_w"] = jnp.concatenate([ap["w"][4 * cin:5 * cin, :] for ap in dil],
                                         axis=1)
    P["aspp_center_sb"] = jnp.concatenate([ap["sb"] for ap in dil], axis=1)
    P["aspp_center_min_rate"] = min(ap["rate"] for ap in dil)
    P["pool_w"] = pg.conv(1, 2048, 256)
    P["pool_sb"] = identity_affine(pg.bias(256))
    w, cb = pg.conv(1, 1280, 256), pg.bias(256)
    P["fc1"] = dict(w=w, sb=fold_conv_bias(bn_affine(256), cb))
    P["fc2_w"] = pg.conv(1, 256, num_classes)
    P["fc2_sb"] = identity_affine(pg.bias(num_classes))
    return P


# ----------------------------------------------------------------------------
# Forward pass
# ----------------------------------------------------------------------------
def bottleneck_fwd(x, p):
    # TODO(synk): the ~100 sequential pallas_calls each expose a small weight-DMA
    #             prologue; a cross-call prefetch chain (P10) would hide it.
    out = conv_bn_act(x, p["w1"], p["sb1"], k=1, relu=True)
    out = conv_bn_act(out, p["w2"], p["sb2"], k=3, stride=p["stride"],
                      dilation=p["rate"], padding=p["rate"], relu=True)
    if "wd" in p:
        residual = conv_bn_act(x, p["wd"], p["sbd"], k=1,
                               stride=p["stride"], relu=False)
    else:
        residual = x
    return conv_bn_act(out, p["w3"], p["sb3"], k=1, relu=True, residual=residual)


def resnet_fwd(x, P):
    x = conv_bn_act(x, P["conv1_w"], P["bn1"], k=7, stride=2, padding=3, relu=True)
    x = maxpool_3x3_s2(x)
    for name in ("layer1", "layer2", "layer3", "layer4"):
        for blk in P[name]:
            x = bottleneck_fwd(x, blk)
    return x


def _bilinear_matrix(size_in, factor):
    # PyTorch F.upsample/F.interpolate(mode='bilinear') semantics, align_corners=False.
    size_out = size_in * factor
    o = np.arange(size_out, dtype=np.float64)
    src = np.maximum((o + 0.5) / factor - 0.5, 0.0)
    i0 = np.minimum(np.floor(src).astype(np.int64), size_in - 1)
    i1 = np.minimum(i0 + 1, size_in - 1)
    w1 = src - i0
    m = np.zeros((size_out, size_in), np.float64)
    m[np.arange(size_out), i0] += 1.0 - w1
    m[np.arange(size_out), i1] += w1
    return m


def bilinear_upsample_nchw(y_nhwc, factor):
    # Single fused matmul: out[(n,c), (ho,wo)] = sum_{(hi,wi)} kron(Mh, Mw) * y;
    # output slab is lane-dense (Ho*Wo) and already in NCHW order.  Runs in bf16
    # (f32 accumulate, f32 out) so v5e does not hit the f32-emulation MXU path.
    N, H, W, C = y_nhwc.shape
    kmat = np.kron(_bilinear_matrix(H, factor), _bilinear_matrix(W, factor))  # (HoWo, HW)
    b = jnp.asarray(kmat.T, jnp.float32)                                       # (HW, HoWo)
    a = jnp.transpose(y_nhwc, (0, 3, 1, 2)).reshape(N * C, H * W)
    sb = jnp.stack([jnp.ones((b.shape[1],), jnp.float32),
                    jnp.zeros((b.shape[1],), jnp.float32)])
    out = matmul_affine(a, b, sb, relu=False, out_dtype=jnp.float32)
    return out.reshape(N, C, H * factor, W * factor)


def deeplabv3_fwd(x_nchw, P):
    x = jnp.transpose(x_nchw, (0, 2, 3, 1)).astype(jnp.bfloat16)     # NCHW -> NHWC
    feat = resnet_fwd(x, P["resnet"])                                # (N, h, w, 2048)
    N, h, w, C = feat.shape
    M = N * h * w
    feat2d = feat.reshape(M, C)

    outs = []
    # rate-1 ASPP branch: genuine 3x3 conv (dilation < feature size).
    ap0 = P["aspp"][0]
    b1 = conv_bn_act(feat, ap0["w"], ap0["sb"], k=3, dilation=ap0["rate"],
                     padding=ap0["rate"], relu=True)
    outs.append(b1.reshape(M, -1))

    if P["aspp_center_min_rate"] >= max(h, w):
        # Rates 6/12/18 at this feature size: all three dilated convs collapse to one
        # fused center-tap 1x1 matmul (K 3*18432 -> 2048, one weight stream, one call).
        outs.append(matmul_affine(feat2d, P["aspp_center_w"],
                                  P["aspp_center_sb"], relu=True))
    else:
        for ap in P["aspp"][1:]:
            o = conv_bn_act(feat, ap["w"], ap["sb"], k=3, dilation=ap["rate"],
                            padding=ap["rate"], relu=True)
            outs.append(o.reshape(M, -1))

    # Image-pooling branch: AdaptiveMaxPool2d(1) + 1x1 conv (bias, no BN/ReLU),
    # nearest-upsampled back to (h, w) == broadcast.
    g = global_max_pool(feat)                                         # (N, 2048)
    pooled = matmul_affine(g, P["pool_w"], P["pool_sb"], relu=False)  # (N, 256)
    outs.append(jnp.broadcast_to(pooled[:, None, :],
                                 (N, h * w, pooled.shape[-1])).reshape(M, -1))

    cat = jnp.concatenate(outs, axis=-1)                              # (M, 1280)
    # TODO(synk): Dropout2d(0.5) treated as identity and BatchNorm uses running
    #             statistics (eval-mode forward semantics).
    y = matmul_affine(cat, P["fc1"]["w"], P["fc1"]["sb"], relu=True)  # (M, 256)
    y = matmul_affine(y, P["fc2_w"], P["fc2_sb"], relu=False,
                      out_dtype=jnp.float32)                          # (M, ncls)
    return bilinear_upsample_nchw(y.reshape(N, h, w, -1), 16)         # NCHW output


if __name__ == "__main__":
    num_classes = 8
    key = jax.random.PRNGKey(0)
    pkey, xkey = jax.random.split(key)
    params = make_deeplab(ParamGen(pkey), num_classes)
    x = jax.random.normal(xkey, (2, 3, 64, 64), jnp.float32)   # NCHW, like PyTorch input
    out = deeplabv3_fwd(x, params)
    out = jax.block_until_ready(out)
    assert out.shape == (2, num_classes, 64, 64), out.shape
    assert bool(jnp.all(jnp.isfinite(out)))
    print("KERNEL_OK")
</pallas_src>

<mosaic_0001>
module attributes {stable_mosaic.version = 11 : i64} {
  func.func @mm_single_kernel(%arg0: i32, %arg1: i32, %arg2: memref<512x147xbf16, #tpu.memory_space<vmem>>, %arg3: memref<147x64xbf16, #tpu.memory_space<vmem>>, %arg4: memref<2x64xf32, #tpu.memory_space<vmem>>, %arg5: memref<512x64xbf16, #tpu.memory_space<vmem>>) attributes {dimension_semantics = [#tpu.dimension_semantics<parallel>, #tpu.dimension_semantics<parallel>], iteration_bounds = array<i64: 4, 1>, scalar_prefetch = 0 : i64, scratch_operands = 0 : i64, tpu.core_type = #tpu.core_type<tc>, window_params = [{transform_indices = @transform_0, window_bounds = array<i64: 512, 147>}, {transform_indices = @transform_1, window_bounds = array<i64: 147, 64>}, {transform_indices = @transform_2, window_bounds = array<i64: 2, 64>}, {transform_indices = @transform_3, window_bounds = array<i64: 512, 64>}]} {
    %c0 = arith.constant 0 : index
    %c0_0 = arith.constant 0 : index
    %0 = vector.load %arg2[%c0, %c0_0] : memref<512x147xbf16, #tpu.memory_space<vmem>>, vector<512x147xbf16>
    %c0_1 = arith.constant 0 : index
    %c0_2 = arith.constant 0 : index
    %1 = vector.load %arg3[%c0_1, %c0_2] : memref<147x64xbf16, #tpu.memory_space<vmem>>, vector<147x64xbf16>
    %cst = arith.constant dense<0.000000e+00> : vector<512x64xf32>
    %2 = tpu.matmul %0, %1, %cst {dimension_numbers = #tpu.dot_dimension_numbers<[1], [0], [0], [1], [0, 0, 1, 1], [], []>} : vector<512x147xbf16>, vector<147x64xbf16>, vector<512x64xf32> -> vector<512x64xf32>
    %c0_3 = arith.constant 0 : index
    %c0_4 = arith.constant 0 : index
    %3 = vector.load %arg4[%c0_3, %c0_4] : memref<2x64xf32, #tpu.memory_space<vmem>>, vector<1x64xf32>
    %4 = vector.broadcast %3 : vector<1x64xf32> to vector<512x64xf32>
    %5 = arith.mulf %2, %4 : vector<512x64xf32>
    %c1 = arith.constant 1 : index
    %c0_5 = arith.constant 0 : index
    %6 = vector.load %arg4[%c1, %c0_5] : memref<2x64xf32, #tpu.memory_space<vmem>>, vector<1x64xf32>
    %7 = vector.broadcast %6 : vector<1x64xf32> to vector<512x64xf32>
    %8 = arith.addf %5, %7 : vector<512x64xf32>
    %cst_6 = arith.constant 0.000000e+00 : f32
    %9 = vector.broadcast %cst_6 : f32 to vector<512x64xf32>
    %10 = arith.maximumf %8, %9 : vector<512x64xf32>
    %11 = arith.truncf %10 : vector<512x64xf32> to vector<512x64xbf16>
    %c0_7 = arith.constant 0 : index
    %c0_8 = arith.constant 0 : index
    %12 = vector.load %arg5[%c0_7, %c0_8] : memref<512x64xbf16, #tpu.memory_space<vmem>>, vector<512x64xbf16>
    tpu.vector_store %arg5[%c0_7, %c0_8], %11 {strides = array<i32>} : memref<512x64xbf16, #tpu.memory_space<vmem>>, vector<512x64xbf16>,
    return
  }
  func.func @transform_0(%arg0: i32, %arg1: i32) -> (i32, i32) {
    %c0_i32 = arith.constant 0 : i32
    %c0_i32_0 = arith.constant 0 : i32
    return %arg0, %c0_i32 : i32, i32
  }
  func.func @transform_1(%arg0: i32, %arg1: i32) -> (i32, i32) {
    %c0_i32 = arith.constant 0 : i32
    %c0_i32_0 = arith.constant 0 : i32
    return %c0_i32, %arg1 : i32, i32
  }
  func.func @transform_2(%arg0: i32, %arg1: i32) -> (i32, i32) {
    %c0_i32 = arith.constant 0 : i32
    %c0_i32_0 = arith.constant 0 : i32
    return %c0_i32, %arg1 : i32, i32
  }
  func.func @transform_3(%arg0: i32, %arg1: i32) -> (i32, i32) {
    %c0_i32 = arith.constant 0 : i32
    return %arg0, %arg1 : i32, i32
  }
}

</mosaic_0001>

<bundles_post_ra>
// kernel: _mm_call.1
= control target key start
LH: loop header
LB: loop body
LE: loop exit
PB: predicated region body
PF: predicated region fallthrough
CT: control target
= control target key end

     0   :  { %s2130_s12 = smov 0   ;;  %s2132_s13 = smov 0   ;;  %s2563_s0 = inlined_call_operand.vmem [shape: bf16[2048,147], index: 0, kind: input, shape index: {}]   ;;  %s2564_s1 = inlined_call_operand.vmem [shape: bf16[147,64], index: 1, kind: input, shape index: {}]   ;;  %s2565_s2 = inlined_call_operand.vmem [shape: f32[2,64], index: 2, kind: input, shape index: {}]   ;;  %s2566_s3 = inlined_call_operand.vmem [shape: bf16[2048,64], index: 3, kind: output, shape index: {}]  }
   0x1   :  { %s2134_s14 = smov 0  }
   0x2 LB: > { %s25_s15 = sadd.s32 1, %s2102_s13  ;;  %p1687_p0 = scmp.ge.s32.totalorder %s2106_s14, 1  ;;  %s2106_s14 = sphi %s2134_s14, %s13_s14   ;;  %s2102_s13 = sphi %s2132_s13, %s2568_s13   ;;  %s2098_s12 = sphi %s2130_s12, %s2567_s12  }
   0x3   : > { %p27_p1 = scmp.ge.s32.totalorder %s25_s15, 4  ;;  %p171_p2 = scmp.lt.s32.totalorder %s2106_s14, 5 }
   0x5   : > { %s2570_s15 = smov (%p27_p1, %s25_s15), 0  ;;  %p172_p3 = pnand %p1687_p0, %p171_p2 }
   0x6   : > { %v1978_v0 = vld [vmem:[%s2564_s1] sm:$0xff] (!%p172_p3)   ;;  %v2108_v1 = vmov (!%p172_p3), 0   ;;  %v1979_v2 = vld [vmem:[%s2564_s1 + $0x8] sm:$0xff] (!%p172_p3)   ;;  %v1980_v3 = vld [vmem:[%s2564_s1 + $0x10] sm:$0xff] (!%p172_p3)   ;;  %s1688_s22 = sshll.u32 (!%p172_p3), %s2098_s12, 6  ;;  %vm660_vm0 = vcmask (!%p172_p3), 154624  }
   0x7   : > { %175 = sbr.rel (%p172_p3) target bundleno = 390 (0x186), region = 32  ;;  %764 = vmatprep.subr.bf16.mxu0 (!%p172_p3), %v2108_v1  ;;  %1932 = vmatprep.subr.bf16.mxu1 (!%p172_p3), %v2108_v1  ;;  %p208_p4 = scmp.lt.s32.totalorder (!%p172_p3), %s1688_s22, 255  ;;  %v1981_v4 = vld [vmem:[%s2564_s1 + $0x18] sm:$0xff] (!%p172_p3)   ;;  %v1982_v5 = vld [vmem:[%s2564_s1 + $0x20] sm:$0xff] (!%p172_p3)   ;;  %v1983_v8 = vld [vmem:[%s2564_s1 + $0x28] sm:$0xff] (!%p172_p3)   ;;  %vm757_vm1 = vcmask (!%p172_p3), 1040384  }
   0x8   : > { %765 = vmatpush1.bf16.msra.mxu0 (!%p172_p3), %v1978_v0  ;;  %1942 = vmatpush1.bf16.msra.mxu1 (!%p172_p3), %v1978_v0  ;;  %v1984_v9 = vld [vmem:[%s2564_s1 + $0x30] sm:$0xff] (!%p172_p3)   ;;  %v1985_v10 = vld [vmem:[%s2564_s1 + $0x38] sm:$0xff] (!%p172_p3)   ;;  %vm758_vm2 = vcmask (!%p172_p3), 1041408   ;;  %v2109_v11 = vmov (!%p172_p3), 65535   ;;  %v1986_v13 = vld [vmem:[%s2564_s1 + $0x40] sm:$0xff] (!%p172_p3)   ;;  %vm1511_vm3 = vcmask (!%p172_p3), 519168  }
   0x9   : > { %766 = vmatprep.subr.bf16.mxu0 (!%p172_p3), %v2108_v1  ;;  %1933 = vmatprep.subr.bf16.mxu1 (!%p172_p3), %v2108_v1  ;;  %v759_v12 = vsel (!%p172_p3), %vm757_vm1, 4294967295, %v2109_v11  ;;  %v1987_v14 = vld [vmem:[%s2564_s1 + $0x48] ss:$0 sps:$4 sm:$0x33] (!%p172_p3)  }
   0xa   : > { %v760_v15 = vsel (!%p172_p3), %vm758_vm2, %v759_v12, 0 }
   0xb   : > { %v762_v16 = vand.u32 (!%p172_p3), %v1987_v14, %v760_v15  ;;  %v2285_v15 = vld [vmem:[%s2565_s2] ss:$0 sm:$0xff] (!%p172_p3) }
   0xc   : > { %767 = vmatpush1.bf16.msra.mxu0 (!%p172_p3), %v1979_v2  ;;  %1943 = vmatpush1.bf16.msra.mxu1 (!%p172_p3), %v1979_v2 }
   0xd   : > { %768 = vmatprep.subr.bf16.mxu0 (!%p172_p3), %v2108_v1  ;;  %1934 = vmatprep.subr.bf16.mxu1 (!%p172_p3), %v2108_v1 }
   0xe   : > { %s2572_s22 = smov (!%p208_p4, %s1688_s22), 255 }
   0xf   : > { %s1867_s25 = sshll.u32 %s2572_s22, 3  ;;  %s1692_s21 = sshll.u32 %s2572_s22, 2 }
  0x10   : > { %769 = vmatpush1.bf16.msra.mxu0 %v1980_v3  ;;  %1944 = vmatpush1.bf16.msra.mxu1 %v1980_v3  ;;  %s2166_s28 = scalar_lea.vmem %s2563_s0, %s1867_s25  ;;  %s2304_s22 = scalar_lea.vmem %s2566_s3, %s1692_s21 }
  0x11   : > { %770 = vmatprep.subr.bf16.mxu0 %v2108_v1  ;;  %1935 = vmatprep.subr.bf16.mxu1 %v2108_v1  ;;  %v1990_v6 = vld [vmem:[%s2166_s28 + $0x4] ss:$8 sps:$4 sm:$0xff]   ;;  %v1988_v17 = vld [vmem:[%s2166_s28] ss:$8 sps:$4 sm:$0xff]   ;;  %v1994_v19 = vld [vmem:[%s2166_s28 + $0x14] ss:$8 sps:$4 sm:$0xff]  }
  0x12   : > { %v1993_v7 = vld [vmem:[%s2166_s28 + $0x104] ss:$8 sps:$4 sm:$0xff]   ;;  %1767 = vmatprep.mubr.msk.bf16.mxu0 %vm660_vm0, %v1990_v6  ;;  %v1991_v18 = vld [vmem:[%s2166_s28 + $0x100] ss:$8 sps:$4 sm:$0xff]   ;;  %v1996_v20 = vld [vmem:[%s2166_s28 + $0x114] ss:$8 sps:$4 sm:$0xff]  }
  0x13   : > { %1783 = vmatprep.mubr.msk.bf16.mxu1 %vm660_vm0, %v1993_v7  ;;  %v1998_v21 = vld [vmem:[%s2166_s28 + $0x10] ss:$8 sps:$4 sm:$0xff]   ;;  %v2000_v23 = vld [vmem:[%s2166_s28 + $0x24] ss:$8 sps:$4 sm:$0xff]   ;;  %v2004_v25 = vld [vmem:[%s2166_s28 + $0x20] ss:$8 sps:$4 sm:$0xff]  }
  0x14   : > { %771 = vmatpush1.bf16.msra.mxu0 %v1981_v4  ;;  %1945 = vmatpush1.bf16.msra.mxu1 %v1981_v4  ;;  %v1999_v22 = vld [vmem:[%s2166_s28 + $0x110] ss:$8 sps:$4 sm:$0xff]   ;;  %v2002_v24 = vld [vmem:[%s2166_s28 + $0x124] ss:$8 sps:$4 sm:$0xff]   ;;  %v2005_v26 = vld [vmem:[%s2166_s28 + $0x120] ss:$8 sps:$4 sm:$0xff]  }
  0x15   : > { %772 = vmatprep.subr.bf16.mxu0 %v2108_v1  ;;  %1936 = vmatprep.subr.bf16.mxu1 %v2108_v1  ;;  %v2006_v27 = vld [vmem:[%s2166_s28 + $0x34] ss:$8 sps:$4 sm:$0xff]   ;;  %v2010_v29 = vld [vmem:[%s2166_s28 + $0x30] ss:$8 sps:$4 sm:$0xff]   ;;  %v2012_v31 = vld [vmem:[%s2166_s28 + $0x44] ss:$8 sps:$4 sm:$0xff]  }
  0x16   : > { %v2008_v28 = vld [vmem:[%s2166_s28 + $0x134] ss:$8 sps:$4 sm:$0xff]   ;;  %v2011_v30 = vld [vmem:[%s2166_s28 + $0x130] ss:$8 sps:$4 sm:$0xff]   ;;  %v2014_v32 = vld [vmem:[%s2166_s28 + $0x144] ss:$8 sps:$4 sm:$0xff]  }
  0x17   : > { %v2016_v33 = vld [vmem:[%s2166_s28 + $0x40] ss:$8 sps:$4 sm:$0xff]   ;;  %v2018_v35 = vld [vmem:[%s2166_s28 + $0x54] ss:$8 sps:$4 sm:$0xff]   ;;  %v2022_v37 = vld [vmem:[%s2166_s28 + $0x50] ss:$8 sps:$4 sm:$0xff]  }
  0x18   : > { %773 = vmatpush1.bf16.msra.mxu0 %v1982_v5  ;;  %1946 = vmatpush1.bf16.msra.mxu1 %v1982_v5  ;;  %v2017_v34 = vld [vmem:[%s2166_s28 + $0x140] ss:$8 sps:$4 sm:$0xff]   ;;  %v2020_v36 = vld [vmem:[%s2166_s28 + $0x154] ss:$8 sps:$4 sm:$0xff]   ;;  %v2023_v38 = vld [vmem:[%s2166_s28 + $0x150] ss:$8 sps:$4 sm:$0xff]  }
  0x19   : > { %774 = vmatprep.subr.bf16.mxu0 %v2108_v1  ;;  %1937 = vmatprep.subr.bf16.mxu1 %v2108_v1  ;;  %v2024_v39 = vld [vmem:[%s2166_s28 + $0x64] ss:$8 sps:$4 sm:$0xff]   ;;  %v2028_v41 = vld [vmem:[%s2166_s28 + $0x60] ss:$8 sps:$4 sm:$0xff]   ;;  %v2030_v43 = vld [vmem:[%s2166_s28 + $0x74] ss:$8 sps:$4 sm:$0xff]  }
  0x1a   : > { %v2026_v40 = vld [vmem:[%s2166_s28 + $0x164] ss:$8 sps:$4 sm:$0xff]   ;;  %v2029_v42 = vld [vmem:[%s2166_s28 + $0x160] ss:$8 sps:$4 sm:$0xff]   ;;  %v2032_v44 = vld [vmem:[%s2166_s28 + $0x174] ss:$8 sps:$4 sm:$0xff]  }
  0x1b   : > { %v2034_v45 = vld [vmem:[%s2166_s28 + $0x70] ss:$8 sps:$4 sm:$0xff]   ;;  %v2036_v47 = vld [vmem:[%s2166_s28 + $0x84] ss:$8 sps:$4 sm:$0xff]   ;;  %v2040_v49 = vld [vmem:[%s2166_s28 + $0x80] ss:$8 sps:$4 sm:$0xff]  }
  0x1c   : > { %775 = vmatpush1.bf16.msra.mxu0 %v1983_v8  ;;  %1947 = vmatpush1.bf16.msra.mxu1 %v1983_v8  ;;  %v2035_v46 = vld [vmem:[%s2166_s28 + $0x170] ss:$8 sps:$4 sm:$0xff]   ;;  %v2038_v48 = vld [vmem:[%s2166_s28 + $0x184] ss:$8 sps:$4 sm:$0xff]   ;;  %v2041_v50 = vld [vmem:[%s2166_s28 + $0x180] ss:$8 sps:$4 sm:$0xff]  }
  0x1d   : > { %776 = vmatprep.subr.bf16.mxu0 %v2108_v1  ;;  %1938 = vmatprep.subr.bf16.mxu1 %v2108_v1  ;;  %v2042_v51 = vld [vmem:[%s2166_s28 + $0x94] ss:$8 sps:$4 sm:$0xff]   ;;  %v2046_v53 = vld [vmem:[%s2166_s28 + $0x90] ss:$8 sps:$4 sm:$0xff]   ;;  %v2048_v55 = vld [vmem:[%s2166_s28 + $0xa4] ss:$8 sps:$4 sm:$0xff]  }
  0x1e   : > { %v2044_v52 = vld [vmem:[%s2166_s28 + $0x194] ss:$8 sps:$4 sm:$0xff]   ;;  %v2047_v54 = vld [vmem:[%s2166_s28 + $0x190] ss:$8 sps:$4 sm:$0xff]   ;;  %v2050_v56 = vld [vmem:[%s2166_s28 + $0x1a4] ss:$8 sps:$4 sm:$0xff]  }
  0x1f   : > { %v2052_v57 = vld [vmem:[%s2166_s28 + $0xa0] ss:$8 sps:$4 sm:$0xff]   ;;  %v2054_v59 = vld [vmem:[%s2166_s28 + $0xb4] ss:$8 sps:$4 sm:$0xff]   ;;  %v2058_v61 = vld [vmem:[%s2166_s28 + $0xb0] ss:$8 sps:$4 sm:$0xff]  }
  0x20   : > { %777 = vmatpush1.bf16.msra.mxu0 %v1984_v9  ;;  %1948 = vmatpush1.bf16.msra.mxu1 %v1984_v9  ;;  %v2053_v58 = vld [vmem:[%s2166_s28 + $0x1a0] ss:$8 sps:$4 sm:$0xff]   ;;  %v2056_v60 = vld [vmem:[%s2166_s28 + $0x1b4] ss:$8 sps:$4 sm:$0xff]   ;;  %v2059_v62 = vld [vmem:[%s2166_s28 + $0x1b0] ss:$8 sps:$4 sm:$0xff]  }
  0x21   : > { %778 = vmatprep.subr.bf16.mxu0 %v2108_v1  ;;  %1939 = vmatprep.subr.bf16.mxu1 %v2108_v1  ;;  %v2060_v63 = vld [vmem:[%s2166_s28 + $0xc4] ss:$8 sps:$4 sm:$0xff]   ;;  %v2065_v2 = vld [vmem:[%s2166_s28 + $0x1c0] ss:$8 sps:$4 sm:$0xff]   ;;  %v2066_v3 = vld [vmem:[%s2166_s28 + $0xd4] ss:$8 sps:$4 sm:$0xff]  }
  0x22   : > { %v2062_v0 = vld [vmem:[%s2166_s28 + $0x1c4] ss:$8 sps:$4 sm:$0xff]   ;;  %v2068_v4 = vld [vmem:[%s2166_s28 + $0x1d4] ss:$8 sps:$4 sm:$0xff]   ;;  %v2070_v5 = vld [vmem:[%s2166_s28 + $0xd0] ss:$8 sps:$4 sm:$0xff]  }
  0x23   : > { %v2071_v6 = vld [vmem:[%s2166_s28 + $0x1d0] ss:$8 sps:$4 sm:$0xff]   ;;  %v2072_v7 = vld [vmem:[%s2166_s28 + $0xe4] ss:$8 sps:$4 sm:$0xff]   ;;  %v2076_v9 = vld [vmem:[%s2166_s28 + $0xe0] ss:$8 sps:$4 sm:$0xff]  }
  0x24   : > { %779 = vmatpush1.bf16.msra.mxu0 %v1985_v10  ;;  %1949 = vmatpush1.bf16.msra.mxu1 %v1985_v10  ;;  %v2074_v8 = vld [vmem:[%s2166_s28 + $0x1e4] ss:$8 sps:$4 sm:$0xff]   ;;  %v2077_v10 = vld [vmem:[%s2166_s28 + $0x1e0] ss:$8 sps:$4 sm:$0xff]   ;;  %v2078_v11 = vld [vmem:[%s2166_s28 + $0xf4] ss:$8 sps:$4 sm:$0xff]  }
  0x25   : > { %780 = vmatprep.subr.bf16.mxu0 %v2108_v1  ;;  %1940 = vmatprep.subr.bf16.mxu1 %v2108_v1  ;;  %v2080_v12 = vld [vmem:[%s2166_s28 + $0x1f4] ss:$8 sps:$4 sm:$0xff]   ;;  %v2083_v14 = vld [vmem:[%s2166_s28 + $0x1f0] ss:$8 sps:$4 sm:$0xff]  }
  0x28   : > { %781 = vmatpush1.bf16.msra.mxu0 %v1986_v13  ;;  %1950 = vmatpush1.bf16.msra.mxu1 %v1986_v13  ;;  %v2082_v13 = vld [vmem:[%s2166_s28 + $0xf0] ss:$8 sps:$4 sm:$0xff]  }
  0x29   : > { %782 = vmatprep.subr.bf16.mxu0 %v2108_v1  ;;  %1941 = vmatprep.subr.bf16.mxu1 %v2108_v1  ;;  %v2064_v1 = vld [vmem:[%s2166_s28 + $0xc0] ss:$8 sps:$4 sm:$0xff]  }
  0x2c   : > { %783 = vmatpush1.bf16.msra.mxu0 %v762_v16  ;;  %1951 = vmatpush1.bf16.msra.mxu1 %v762_v16 }
  0x2f   : > { %797 = vmatmul.mubr.bf16.vlgmr.msra.gmra.mrb[0].mxu0 %v1988_v17  ;;  %925 = vmatmul.mubr.bf16.vlgmr.msra.gmra.mrb[0].mxu1 %v1991_v18  ;;  %v2290_v17 = vld [vmem:[%s2565_s2 + $0x1] ss:$0 sm:$0xff] }
  0x30   : > { %1768 = vmatprep.mubr.msk.bf16.mxu0 %vm660_vm0, %v1994_v19  ;;  %1784 = vmatprep.mubr.msk.bf16.mxu1 %vm660_vm0, %v1996_v20 }
  0x37   : > { %805 = vmatmul.mubr.bf16.gmra.mrb[4].mxu0 %v1998_v21  ;;  %933 = vmatmul.mubr.bf16.gmra.mrb[4].mxu1 %v1999_v22 }
  0x38   : > { %1769 = vmatprep.mubr.msk.bf16.mxu0 %vm660_vm0, %v2000_v23  ;;  %1785 = vmatprep.mubr.msk.bf16.mxu1 %vm660_vm0, %v2002_v24 }
  0x3f   : > { %813 = vmatmul.mubr.bf16.gmra.mrb[8].mxu0 %v2004_v25  ;;  %941 = vmatmul.mubr.bf16.gmra.mrb[8].mxu1 %v2005_v26 }
  0x40   : > { %1770 = vmatprep.mubr.msk.bf16.mxu0 %vm660_vm0, %v2006_v27  ;;  %1786 = vmatprep.mubr.msk.bf16.mxu1 %vm660_vm0, %v2008_v28 }
  0x47   : > { %821 = vmatmul.mubr.bf16.gmra.mrb[12].mxu0 %v2010_v29  ;;  %949 = vmatmul.mubr.bf16.gmra.mrb[12].mxu1 %v2011_v30 }
  0x48   : > { %1771 = vmatprep.mubr.msk.bf16.mxu0 %vm660_vm0, %v2012_v31  ;;  %1787 = vmatprep.mubr.msk.bf16.mxu1 %vm660_vm0, %v2014_v32 }
  0x4f   : > { %829 = vmatmul.mubr.bf16.gmra.mrb[16].mxu0 %v2016_v33  ;;  %957 = vmatmul.mubr.bf16.gmra.mrb[16].mxu1 %v2017_v34 }
  0x50   : > { %1772 = vmatprep.mubr.msk.bf16.mxu0 %vm660_vm0, %v2018_v35  ;;  %1788 = vmatprep.mubr.msk.bf16.mxu1 %vm660_vm0, %v2020_v36 }
  0x57   : > { %837 = vmatmul.mubr.bf16.gmra.mrb[20].mxu0 %v2022_v37  ;;  %965 = vmatmul.mubr.bf16.gmra.mrb[20].mxu1 %v2023_v38 }
  0x58   : > { %1773 = vmatprep.mubr.msk.bf16.mxu0 %vm660_vm0, %v2024_v39  ;;  %1789 = vmatprep.mubr.msk.bf16.mxu1 %vm660_vm0, %v2026_v40 }
  0x5f   : > { %845 = vmatmul.mubr.bf16.gmra.mrb[24].mxu0 %v2028_v41  ;;  %973 = vmatmul.mubr.bf16.gmra.mrb[24].mxu1 %v2029_v42 }
  0x60   : > { %1774 = vmatprep.mubr.msk.bf16.mxu0 %vm660_vm0, %v2030_v43  ;;  %1790 = vmatprep.mubr.msk.bf16.mxu1 %vm660_vm0, %v2032_v44 }
  0x67   : > { %853 = vmatmul.mubr.bf16.gmra.mrb[28].mxu0 %v2034_v45  ;;  %981 = vmatmul.mubr.bf16.gmra.mrb[28].mxu1 %v2035_v46 }
  0x68   : > { %1775 = vmatprep.mubr.msk.bf16.mxu0 %vm660_vm0, %v2036_v47  ;;  %1791 = vmatprep.mubr.msk.bf16.mxu1 %vm660_vm0, %v2038_v48 }
  0x6f   : > { %861 = vmatmul.mubr.bf16.gmra.mrb[32].mxu0 %v2040_v49  ;;  %989 = vmatmul.mubr.bf16.gmra.mrb[32].mxu1 %v2041_v50 }
  0x70   : > { %1776 = vmatprep.mubr.msk.bf16.mxu0 %vm660_vm0, %v2042_v51  ;;  %1792 = vmatprep.mubr.msk.bf16.mxu1 %vm660_vm0, %v2044_v52 }
  0x77   : > { %869 = vmatmul.mubr.bf16.gmra.mrb[36].mxu0 %v2046_v53  ;;  %997 = vmatmul.mubr.bf16.gmra.mrb[36].mxu1 %v2047_v54 }
  0x78   : > { %1777 = vmatprep.mubr.msk.bf16.mxu0 %vm660_vm0, %v2048_v55  ;;  %1793 = vmatprep.mubr.msk.bf16.mxu1 %vm660_vm0, %v2050_v56 }
  0x7f   : > { %877 = vmatmul.mubr.bf16.gmra.mrb[40].mxu0 %v2052_v57  ;;  %1005 = vmatmul.mubr.bf16.gmra.mrb[40].mxu1 %v2053_v58 }
  0x80   : > { %1778 = vmatprep.mubr.msk.bf16.mxu0 %vm660_vm0, %v2054_v59  ;;  %1794 = vmatprep.mubr.msk.bf16.mxu1 %vm660_vm0, %v2056_v60 }
  0x87   : > { %885 = vmatmul.mubr.bf16.gmra.mrb[44].mxu0 %v2058_v61  ;;  %1013 = vmatmul.mubr.bf16.gmra.mrb[44].mxu1 %v2059_v62 }
  0x88   : > { %1779 = vmatprep.mubr.msk.bf16.mxu0 %vm660_vm0, %v2060_v63  ;;  %1795 = vmatprep.mubr.msk.bf16.mxu1 %vm660_vm0, %v2062_v0 }
  0x8f   : > { %893 = vmatmul.mubr.bf16.gmra.mrb[48].mxu0 %v2064_v1  ;;  %1021 = vmatmul.mubr.bf16.gmra.mrb[48].mxu1 %v2065_v2 }
  0x90   : > { %1780 = vmatprep.mubr.msk.bf16.mxu0 %vm660_vm0, %v2066_v3  ;;  %1796 = vmatprep.mubr.msk.bf16.mxu1 %vm660_vm0, %v2068_v4 }
  0x97   : > { %901 = vmatmul.mubr.bf16.gmra.mrb[52].mxu0 %v2070_v5  ;;  %1029 = vmatmul.mubr.bf16.gmra.mrb[52].mxu1 %v2071_v6 }
  0x98   : > { %1781 = vmatprep.mubr.msk.bf16.mxu0 %vm660_vm0, %v2072_v7  ;;  %1797 = vmatprep.mubr.msk.bf16.mxu1 %vm660_vm0, %v2074_v8 }
  0x9f   : > { %909 = vmatmul.mubr.bf16.gmra.mrb[56].mxu0 %v2076_v9  ;;  %1037 = vmatmul.mubr.bf16.gmra.mrb[56].mxu1 %v2077_v10 }
  0xa0   : > { %1782 = vmatprep.mubr.msk.bf16.mxu0 %vm660_vm0, %v2078_v11  ;;  %1798 = vmatprep.mubr.msk.bf16.mxu1 %vm660_vm0, %v2080_v12 }
  0xa7   : > { %917 = vmatmul.mubr.bf16.gmra.mrb[60].mxu0 %v2082_v13  ;;  %1045 = vmatmul.mubr.bf16.gmra.mrb[60].mxu1 %v2083_v14 }
 0x102   : > { %v798_v16 = vpop.f32.mrb[0].mxu0  ;;  %v926_v18 = vpop.f32.mrb[0].mxu1 }
 0x103   : > { %v1058_v19 = vmul.f32 %v2285_v15, %v798_v16  ;;  %v1090_v20 = vmul.f32 %v2285_v15, %v926_v18  ;;  %v800_v21 = vpop.f32.mrb[1].mxu0  ;;  %v928_v22 = vpop.f32.mrb[1].mxu1 }
 0x104   : > { %v801_v23 = vpop.f32.mrb[2].mxu0  ;;  %v929_v24 = vpop.f32.mrb[2].mxu1 }
 0x105   : > { %v1127_v25 = vadd.f32 %v2290_v17, %v1058_v19  ;;  %v1159_v26 = vadd.f32 %v2290_v17, %v1090_v20  ;;  %v1059_v27 = vmul.f32 %v2285_v15, %v801_v23  ;;  %v1091_v28 = vmul.f32 %v2285_v15, %v929_v24  ;;  %v803_v29 = vpop.f32.mrb[3].mxu0  ;;  %v931_v30 = vpop.f32.mrb[3].mxu1 }
 0x107   : > { %v1191_v31 = vmax.f32 %v1127_v25, 0.0  ;;  %v1223_v32 = vmax.f32 %v1159_v26, 0.0  ;;  %v1128_v33 = vadd.f32 %v2290_v17, %v1059_v27  ;;  %v1160_v34 = vadd.f32 %v2290_v17, %v1091_v28 }
 0x109   : > { %v1868_v35 = vpack.c.bf16 %v1191_v31, %v1191_v31  ;;  %v1900_v36 = vpack.c.bf16 %v1223_v32, %v1223_v32  ;;  %v1192_v37 = vmax.f32 %v1128_v33, 0.0  ;;  %v1224_v38 = vmax.f32 %v1160_v34, 0.0 }
 0x10a   : > { %v806_v39 = vpop.f32.mrb[4].mxu0  ;;  %v934_v40 = vpop.f32.mrb[4].mxu1 }
 0x10b   : > { %1512 = vst.msk [vmem:[%s2304_s22] sm:$0xf] %vm1511_vm3, %v1868_v35  ;;  %1544 = vst.msk [vmem:[%s2304_s22 + $0x80] sm:$0xf] %vm1511_vm3, %v1900_v36  ;;  %v1869_v41 = vpack.c.bf16 %v1192_v37, %v1192_v37  ;;  %v1901_v42 = vpack.c.bf16 %v1224_v38, %v1224_v38  ;;  %v1060_v43 = vmul.f32 %v2285_v15, %v806_v39  ;;  %v808_v45 = vpop.f32.mrb[5].mxu0  ;;  %v936_v46 = vpop.f32.mrb[5].mxu1 }
 0x10c   : > { %v1092_v44 = vmul.f32 %v2285_v15, %v934_v40  ;;  %v809_v47 = vpop.f32.mrb[6].mxu0  ;;  %v937_v48 = vpop.f32.mrb[6].mxu1 }
 0x10d   : > { %1513 = vst.msk [vmem:[%s2304_s22 + $0x4] sm:$0xf] %vm1511_vm3, %v1869_v41  ;;  %1545 = vst.msk [vmem:[%s2304_s22 + $0x84] sm:$0xf] %vm1511_vm3, %v1901_v42  ;;  %v1129_v49 = vadd.f32 %v2290_v17, %v1060_v43  ;;  %v1061_v51 = vmul.f32 %v2285_v15, %v809_v47  ;;  %v1093_v52 = vmul.f32 %v2285_v15, %v937_v48  ;;  %v811_v53 = vpop.f32.mrb[7].mxu0  ;;  %v939_v54 = vpop.f32.mrb[7].mxu1 }
 0x10e   : > { %v1161_v50 = vadd.f32 %v2290_v17, %v1092_v44 }
 0x10f   : > { %v1193_v55 = vmax.f32 %v1129_v49, 0.0  ;;  %v1130_v57 = vadd.f32 %v2290_v17, %v1061_v51  ;;  %v1162_v58 = vadd.f32 %v2290_v17, %v1093_v52 }
 0x110   : > { %v1225_v56 = vmax.f32 %v1161_v50, 0.0 }
 0x111   : > { %v1870_v59 = vpack.c.bf16 %v1193_v55, %v1193_v55  ;;  %v1194_v61 = vmax.f32 %v1130_v57, 0.0  ;;  %v1226_v62 = vmax.f32 %v1162_v58, 0.0 }
 0x112   : > { %v1902_v60 = vpack.c.bf16 %v1225_v56, %v1225_v56  ;;  %v814_v63 = vpop.f32.mrb[8].mxu0  ;;  %v942_v0 = vpop.f32.mrb[8].mxu1 }
 0x113   : > { %1514 = vst.msk [vmem:[%s2304_s22 + $0x8] sm:$0xf] %vm1511_vm3, %v1870_v59  ;;  %v1871_v1 = vpack.c.bf16 %v1194_v61, %v1194_v61  ;;  %v1903_v2 = vpack.c.bf16 %v1226_v62, %v1226_v62  ;;  %v1062_v3 = vmul.f32 %v2285_v15, %v814_v63  ;;  %v1094_v4 = vmul.f32 %v2285_v15, %v942_v0  ;;  %v816_v5 = vpop.f32.mrb[9].mxu0  ;;  %v944_v6 = vpop.f32.mrb[9].mxu1 }
 0x114   : > { %1546 = vst.msk [vmem:[%s2304_s22 + $0x88] sm:$0xf] %vm1511_vm3, %v1902_v60  ;;  %v817_v7 = vpop.f32.mrb[10].mxu0  ;;  %v945_v8 = vpop.f32.mrb[10].mxu1 }
 0x115   : > { %1515 = vst.msk [vmem:[%s2304_s22 + $0xc] sm:$0xf] %vm1511_vm3, %v1871_v1  ;;  %1547 = vst.msk [vmem:[%s2304_s22 + $0x8c] sm:$0xf] %vm1511_vm3, %v1903_v2  ;;  %v1131_v9 = vadd.f32 %v2290_v17, %v1062_v3  ;;  %v1163_v10 = vadd.f32 %v2290_v17, %v1094_v4  ;;  %v1063_v11 = vmul.f32 %v2285_v15, %v817_v7  ;;  %v819_v13 = vpop.f32.mrb[11].mxu0  ;;  %v947_v14 = vpop.f32.mrb[11].mxu1 }
 0x116   : > { %v1095_v12 = vmul.f32 %v2285_v15, %v945_v8 }
 0x117   : > { %v1195_v16 = vmax.f32 %v1131_v9, 0.0  ;;  %v1227_v18 = vmax.f32 %v1163_v10, 0.0  ;;  %v1132_v19 = vadd.f32 %v2290_v17, %v1063_v11 }
 0x118   : > { %v1164_v20 = vadd.f32 %v2290_v17, %v1095_v12 }
 0x119   : > { %v1872_v21 = vpack.c.bf16 %v1195_v16, %v1195_v16  ;;  %v1904_v22 = vpack.c.bf16 %v1227_v18, %v1227_v18  ;;  %v1196_v23 = vmax.f32 %v1132_v19, 0.0 }
 0x11a   : > { %v1228_v24 = vmax.f32 %v1164_v20, 0.0  ;;  %v822_v25 = vpop.f32.mrb[12].mxu0  ;;  %v950_v26 = vpop.f32.mrb[12].mxu1 }
 0x11b   : > { %1516 = vst.msk [vmem:[%s2304_s22 + $0x10] sm:$0xf] %vm1511_vm3, %v1872_v21  ;;  %1548 = vst.msk [vmem:[%s2304_s22 + $0x90] sm:$0xf] %vm1511_vm3, %v1904_v22  ;;  %v1873_v27 = vpack.c.bf16 %v1196_v23, %v1196_v23  ;;  %v1064_v29 = vmul.f32 %v2285_v15, %v822_v25  ;;  %v1096_v30 = vmul.f32 %v2285_v15, %v950_v26  ;;  %v824_v31 = vpop.f32.mrb[13].mxu0  ;;  %v952_v32 = vpop.f32.mrb[13].mxu1 }
 0x11c   : > { %v1905_v28 = vpack.c.bf16 %v1228_v24, %v1228_v24  ;;  %v825_v33 = vpop.f32.mrb[14].mxu0  ;;  %v953_v34 = vpop.f32.mrb[14].mxu1 }
 0x11d   : > { %1517 = vst.msk [vmem:[%s2304_s22 + $0x14] sm:$0xf] %vm1511_vm3, %v1873_v27  ;;  %v1133_v35 = vadd.f32 %v2290_v17, %v1064_v29  ;;  %v1165_v36 = vadd.f32 %v2290_v17, %v1096_v30  ;;  %v1065_v37 = vmul.f32 %v2285_v15, %v825_v33  ;;  %v1097_v38 = vmul.f32 %v2285_v15, %v953_v34  ;;  %v827_v39 = vpop.f32.mrb[15].mxu0  ;;  %v955_v40 = vpop.f32.mrb[15].mxu1 }
 0x11e   : > { %1549 = vst.msk [vmem:[%s2304_s22 + $0x94] sm:$0xf] %vm1511_vm3, %v1905_v28 }
 0x11f   : > { %v1197_v41 = vmax.f32 %v1133_v35, 0.0  ;;  %v1229_v42 = vmax.f32 %v1165_v36, 0.0  ;;  %v1134_v43 = vadd.f32 %v2290_v17, %v1065_v37  ;;  %v1166_v44 = vadd.f32 %v2290_v17, %v1097_v38 }
 0x121   : > { %v1874_v45 = vpack.c.bf16 %v1197_v41, %v1197_v41  ;;  %v1906_v46 = vpack.c.bf16 %v1229_v42, %v1229_v42  ;;  %v1198_v47 = vmax.f32 %v1134_v43, 0.0  ;;  %v1230_v48 = vmax.f32 %v1166_v44, 0.0 }
 0x122   : > { %v830_v49 = vpop.f32.mrb[16].mxu0  ;;  %v958_v50 = vpop.f32.mrb[16].mxu1 }
 0x123   : > { %1518 = vst.msk [vmem:[%s2304_s22 + $0x18] sm:$0xf] %vm1511_vm3, %v1874_v45  ;;  %1550 = vst.msk [vmem:[%s2304_s22 + $0x98] sm:$0xf] %vm1511_vm3, %v1906_v46  ;;  %v1875_v51 = vpack.c.bf16 %v1198_v47, %v1198_v47  ;;  %v1907_v52 = vpack.c.bf16 %v1230_v48, %v1230_v48  ;;  %v1066_v53 = vmul.f32 %v2285_v15, %v830_v49  ;;  %v832_v55 = vpop.f32.mrb[17].mxu0  ;;  %v960_v56 = vpop.f32.mrb[17].mxu1 }
 0x124   : > { %v1098_v54 = vmul.f32 %v2285_v15, %v958_v50  ;;  %v833_v57 = vpop.f32.mrb[18].mxu0  ;;  %v961_v58 = vpop.f32.mrb[18].mxu1 }
 0x125   : > { %1519 = vst.msk [vmem:[%s2304_s22 + $0x1c] sm:$0xf] %vm1511_vm3, %v1875_v51  ;;  %1551 = vst.msk [vmem:[%s2304_s22 + $0x9c] sm:$0xf] %vm1511_vm3, %v1907_v52  ;;  %v1135_v59 = vadd.f32 %v2290_v17, %v1066_v53  ;;  %v1067_v61 = vmul.f32 %v2285_v15, %v833_v57  ;;  %v1099_v62 = vmul.f32 %v2285_v15, %v961_v58  ;;  %v835_v63 = vpop.f32.mrb[19].mxu0  ;;  %v963_v0 = vpop.f32.mrb[19].mxu1 }
 0x126   : > { %v1167_v60 = vadd.f32 %v2290_v17, %v1098_v54 }
 0x127   : > { %v1199_v1 = vmax.f32 %v1135_v59, 0.0  ;;  %v1136_v3 = vadd.f32 %v2290_v17, %v1067_v61  ;;  %v1168_v4 = vadd.f32 %v2290_v17, %v1099_v62 }
 0x128   : > { %v1231_v2 = vmax.f32 %v1167_v60, 0.0 }
 0x129   : > { %v1876_v5 = vpack.c.bf16 %v1199_v1, %v1199_v1  ;;  %v1200_v7 = vmax.f32 %v1136_v3, 0.0  ;;  %v1232_v8 = vmax.f32 %v1168_v4, 0.0 }
 0x12a   : > { %v1908_v6 = vpack.c.bf16 %v1231_v2, %v1231_v2  ;;  %v838_v9 = vpop.f32.mrb[20].mxu0  ;;  %v966_v10 = vpop.f32.mrb[20].mxu1 }
 0x12b   : > { %1520 = vst.msk [vmem:[%s2304_s22 + $0x20] sm:$0xf] %vm1511_vm3, %v1876_v5  ;;  %v1877_v11 = vpack.c.bf16 %v1200_v7, %v1200_v7  ;;  %v1909_v12 = vpack.c.bf16 %v1232_v8, %v1232_v8  ;;  %v1068_v13 = vmul.f32 %v2285_v15, %v838_v9  ;;  %v1100_v14 = vmul.f32 %v2285_v15, %v966_v10  ;;  %v840_v16 = vpop.f32.mrb[21].mxu0  ;;  %v968_v18 = vpop.f32.mrb[21].mxu1 }
 0x12c   : > { %1552 = vst.msk [vmem:[%s2304_s22 + $0xa0] sm:$0xf] %vm1511_vm3, %v1908_v6  ;;  %v841_v19 = vpop.f32.mrb[22].mxu0  ;;  %v969_v20 = vpop.f32.mrb[22].mxu1 }
 0x12d   : > { %1521 = vst.msk [vmem:[%s2304_s22 + $0x24] sm:$0xf] %vm1511_vm3, %v1877_v11  ;;  %1553 = vst.msk [vmem:[%s2304_s22 + $0xa4] sm:$0xf] %vm1511_vm3, %v1909_v12  ;;  %v1137_v21 = vadd.f32 %v2290_v17, %v1068_v13  ;;  %v1169_v22 = vadd.f32 %v2290_v17, %v1100_v14  ;;  %v1069_v23 = vmul.f32 %v2285_v15, %v841_v19  ;;  %v843_v25 = vpop.f32.mrb[23].mxu0  ;;  %v971_v26 = vpop.f32.mrb[23].mxu1 }
 0x12e   : > { %v1101_v24 = vmul.f32 %v2285_v15, %v969_v20 }
 0x12f   : > { %v1201_v27 = vmax.f32 %v1137_v21, 0.0  ;;  %v1233_v28 = vmax.f32 %v1169_v22, 0.0  ;;  %v1138_v29 = vadd.f32 %v2290_v17, %v1069_v23 }
 0x130   : > { %v1170_v30 = vadd.f32 %v2290_v17, %v1101_v24 }
 0x131   : > { %v1878_v31 = vpack.c.bf16 %v1201_v27, %v1201_v27  ;;  %v1910_v32 = vpack.c.bf16 %v1233_v28, %v1233_v28  ;;  %v1202_v33 = vmax.f32 %v1138_v29, 0.0 }
 0x132   : > { %v1234_v34 = vmax.f32 %v1170_v30, 0.0  ;;  %v846_v35 = vpop.f32.mrb[24].mxu0  ;;  %v974_v36 = vpop.f32.mrb[24].mxu1 }
 0x133   : > { %1522 = vst.msk [vmem:[%s2304_s22 + $0x28] sm:$0xf] %vm1511_vm3, %v1878_v31  ;;  %1554 = vst.msk [vmem:[%s2304_s22 + $0xa8] sm:$0xf] %vm1511_vm3, %v1910_v32  ;;  %v1879_v37 = vpack.c.bf16 %v1202_v33, %v1202_v33  ;;  %v1070_v39 = vmul.f32 %v2285_v15, %v846_v35  ;;  %v1102_v40 = vmul.f32 %v2285_v15, %v974_v36  ;;  %v848_v41 = vpop.f32.mrb[25].mxu0  ;;  %v976_v42 = vpop.f32.mrb[25].mxu1 }
 0x134   : > { %v1911_v38 = vpack.c.bf16 %v1234_v34, %v1234_v34  ;;  %v849_v43 = vpop.f32.mrb[26].mxu0  ;;  %v977_v44 = vpop.f32.mrb[26].mxu1 }
 0x135   : > { %1523 = vst.msk [vmem:[%s2304_s22 + $0x2c] sm:$0xf] %vm1511_vm3, %v1879_v37  ;;  %v1139_v45 = vadd.f32 %v2290_v17, %v1070_v39  ;;  %v1171_v46 = vadd.f32 %v2290_v17, %v1102_v40  ;;  %v1071_v47 = vmul.f32 %v2285_v15, %v849_v43  ;;  %v1103_v48 = vmul.f32 %v2285_v15, %v977_v44  ;;  %v851_v49 = vpop.f32.mrb[27].mxu0  ;;  %v979_v50 = vpop.f32.mrb[27].mxu1 }
 0x136   : > { %1555 = vst.msk [vmem:[%s2304_s22 + $0xac] sm:$0xf] %vm1511_vm3, %v1911_v38 }
 0x137   : > { %v1203_v51 = vmax.f32 %v1139_v45, 0.0  ;;  %v1235_v52 = vmax.f32 %v1171_v46, 0.0  ;;  %v1140_v53 = vadd.f32 %v2290_v17, %v1071_v47  ;;  %v1172_v54 = vadd.f32 %v2290_v17, %v1103_v48 }
 0x139   : > { %v1880_v55 = vpack.c.bf16 %v1203_v51, %v1203_v51  ;;  %v1912_v56 = vpack.c.bf16 %v1235_v52, %v1235_v52  ;;  %v1204_v57 = vmax.f32 %v1140_v53, 0.0  ;;  %v1236_v58 = vmax.f32 %v1172_v54, 0.0 }
 0x13a   : > { %v854_v59 = vpop.f32.mrb[28].mxu0  ;;  %v982_v60 = vpop.f32.mrb[28].mxu1 }
 0x13b   : > { %1524 = vst.msk [vmem:[%s2304_s22 + $0x30] sm:$0xf] %vm1511_vm3, %v1880_v55  ;;  %1556 = vst.msk [vmem:[%s2304_s22 + $0xb0] sm:$0xf] %vm1511_vm3, %v1912_v56  ;;  %v1881_v61 = vpack.c.bf16 %v1204_v57, %v1204_v57  ;;  %v1913_v62 = vpack.c.bf16 %v1236_v58, %v1236_v58  ;;  %v1072_v63 = vmul.f32 %v2285_v15, %v854_v59  ;;  %v856_v1 = vpop.f32.mrb[29].mxu0  ;;  %v984_v2 = vpop.f32.mrb[29].mxu1 }
 0x13c   : > { %v1104_v0 = vmul.f32 %v2285_v15, %v982_v60  ;;  %v857_v3 = vpop.f32.mrb[30].mxu0  ;;  %v985_v4 = vpop.f32.mrb[30].mxu1 }
 0x13d   : > { %1525 = vst.msk [vmem:[%s2304_s22 + $0x34] sm:$0xf] %vm1511_vm3, %v1881_v61  ;;  %1557 = vst.msk [vmem:[%s2304_s22 + $0xb4] sm:$0xf] %vm1511_vm3, %v1913_v62  ;;  %v1141_v5 = vadd.f32 %v2290_v17, %v1072_v63  ;;  %v1073_v7 = vmul.f32 %v2285_v15, %v857_v3  ;;  %v1105_v8 = vmul.f32 %v2285_v15, %v985_v4  ;;  %v859_v9 = vpop.f32.mrb[31].mxu0  ;;  %v987_v10 = vpop.f32.mrb[31].mxu1 }
 0x13e   : > { %v1173_v6 = vadd.f32 %v2290_v17, %v1104_v0 }
 0x13f   : > { %v1205_v11 = vmax.f32 %v1141_v5, 0.0  ;;  %v1142_v13 = vadd.f32 %v2290_v17, %v1073_v7  ;;  %v1174_v14 = vadd.f32 %v2290_v17, %v1105_v8 }
 0x140   : > { %v1237_v12 = vmax.f32 %v1173_v6, 0.0 }
 0x141   : > { %v1882_v16 = vpack.c.bf16 %v1205_v11, %v1205_v11  ;;  %v1206_v19 = vmax.f32 %v1142_v13, 0.0  ;;  %v1238_v20 = vmax.f32 %v1174_v14, 0.0 }
 0x142   : > { %v1914_v18 = vpack.c.bf16 %v1237_v12, %v1237_v12  ;;  %v862_v21 = vpop.f32.mrb[32].mxu0  ;;  %v990_v22 = vpop.f32.mrb[32].mxu1 }
 0x143   : > { %1526 = vst.msk [vmem:[%s2304_s22 + $0x38] sm:$0xf] %vm1511_vm3, %v1882_v16  ;;  %v1883_v23 = vpack.c.bf16 %v1206_v19, %v1206_v19  ;;  %v1915_v24 = vpack.c.bf16 %v1238_v20, %v1238_v20  ;;  %v1074_v25 = vmul.f32 %v2285_v15, %v862_v21  ;;  %v1106_v26 = vmul.f32 %v2285_v15, %v990_v22  ;;  %v864_v27 = vpop.f32.mrb[33].mxu0  ;;  %v992_v28 = vpop.f32.mrb[33].mxu1 }
 0x144   : > { %1558 = vst.msk [vmem:[%s2304_s22 + $0xb8] sm:$0xf] %vm1511_vm3, %v1914_v18  ;;  %v865_v29 = vpop.f32.mrb[34].mxu0  ;;  %v993_v30 = vpop.f32.mrb[34].mxu1 }
 0x145   : > { %1527 = vst.msk [vmem:[%s2304_s22 + $0x3c] sm:$0xf] %vm1511_vm3, %v1883_v23  ;;  %1559 = vst.msk [vmem:[%s2304_s22 + $0xbc] sm:$0xf] %vm1511_vm3, %v1915_v24  ;;  %v1143_v31 = vadd.f32 %v2290_v17, %v1074_v25  ;;  %v1175_v32 = vadd.f32 %v2290_v17, %v1106_v26  ;;  %v1075_v33 = vmul.f32 %v2285_v15, %v865_v29  ;;  %v867_v35 = vpop.f32.mrb[35].mxu0  ;;  %v995_v36 = vpop.f32.mrb[35].mxu1 }
 0x146   : > { %v1107_v34 = vmul.f32 %v2285_v15, %v993_v30 }
 0x147   : > { %v1207_v37 = vmax.f32 %v1143_v31, 0.0  ;;  %v1239_v38 = vmax.f32 %v1175_v32, 0.0  ;;  %v1144_v39 = vadd.f32 %v2290_v17, %v1075_v33 }
 0x148   : > { %v1176_v40 = vadd.f32 %v2290_v17, %v1107_v34 }
 0x149   : > { %v1884_v41 = vpack.c.bf16 %v1207_v37, %v1207_v37  ;;  %v1916_v42 = vpack.c.bf16 %v1239_v38, %v1239_v38  ;;  %v1208_v43 = vmax.f32 %v1144_v39, 0.0 }
 0x14a   : > { %v1240_v44 = vmax.f32 %v1176_v40, 0.0  ;;  %v870_v45 = vpop.f32.mrb[36].mxu0  ;;  %v998_v46 = vpop.f32.mrb[36].mxu1 }
 0x14b   : > { %1528 = vst.msk [vmem:[%s2304_s22 + $0x40] sm:$0xf] %vm1511_vm3, %v1884_v41  ;;  %1560 = vst.msk [vmem:[%s2304_s22 + $0xc0] sm:$0xf] %vm1511_vm3, %v1916_v42  ;;  %v1885_v47 = vpack.c.bf16 %v1208_v43, %v1208_v43  ;;  %v1076_v49 = vmul.f32 %v2285_v15, %v870_v45  ;;  %v1108_v50 = vmul.f32 %v2285_v15, %v998_v46  ;;  %v872_v51 = vpop.f32.mrb[37].mxu0  ;;  %v1000_v52 = vpop.f32.mrb[37].mxu1 }
 0x14c   : > { %v1917_v48 = vpack.c.bf16 %v1240_v44, %v1240_v44  ;;  %v873_v53 = vpop.f32.mrb[38].mxu0  ;;  %v1001_v54 = vpop.f32.mrb[38].mxu1 }
 0x14d   : > { %1529 = vst.msk [vmem:[%s2304_s22 + $0x44] sm:$0xf] %vm1511_vm3, %v1885_v47  ;;  %v1145_v55 = vadd.f32 %v2290_v17, %v1076_v49  ;;  %v1177_v56 = vadd.f32 %v2290_v17, %v1108_v50  ;;  %v1077_v57 = vmul.f32 %v2285_v15, %v873_v53  ;;  %v1109_v58 = vmul.f32 %v2285_v15, %v1001_v54  ;;  %v875_v59 = vpop.f32.mrb[39].mxu0  ;;  %v1003_v60 = vpop.f32.mrb[39].mxu1 }
 0x14e   : > { %1561 = vst.msk [vmem:[%s2304_s22 + $0xc4] sm:$0xf] %vm1511_vm3, %v1917_v48 }
 0x14f   : > { %v1209_v61 = vmax.f32 %v1145_v55, 0.0  ;;  %v1241_v62 = vmax.f32 %v1177_v56, 0.0  ;;  %v1146_v63 = vadd.f32 %v2290_v17, %v1077_v57  ;;  %v1178_v0 = vadd.f32 %v2290_v17, %v1109_v58 }
 0x151   : > { %v1886_v1 = vpack.c.bf16 %v1209_v61, %v1209_v61  ;;  %v1918_v2 = vpack.c.bf16 %v1241_v62, %v1241_v62  ;;  %v1210_v3 = vmax.f32 %v1146_v63, 0.0  ;;  %v1242_v4 = vmax.f32 %v1178_v0, 0.0 }
 0x152   : > { %v878_v5 = vpop.f32.mrb[40].mxu0  ;;  %v1006_v6 = vpop.f32.mrb[40].mxu1 }
 0x153   : > { %1530 = vst.msk [vmem:[%s2304_s22 + $0x48] sm:$0xf] %vm1511_vm3, %v1886_v1  ;;  %1562 = vst.msk [vmem:[%s2304_s22 + $0xc8] sm:$0xf] %vm1511_vm3, %v1918_v2  ;;  %v1887_v7 = vpack.c.bf16 %v1210_v3, %v1210_v3  ;;  %v1919_v8 = vpack.c.bf16 %v1242_v4, %v1242_v4  ;;  %v1078_v9 = vmul.f32 %v2285_v15, %v878_v5  ;;  %v880_v11 = vpop.f32.mrb[41].mxu0  ;;  %v1008_v12 = vpop.f32.mrb[41].mxu1 }
 0x154   : > { %v1110_v10 = vmul.f32 %v2285_v15, %v1006_v6  ;;  %v881_v13 = vpop.f32.mrb[42].mxu0  ;;  %v1009_v14 = vpop.f32.mrb[42].mxu1 }
 0x155   : > { %1531 = vst.msk [vmem:[%s2304_s22 + $0x4c] sm:$0xf] %vm1511_vm3, %v1887_v7  ;;  %1563 = vst.msk [vmem:[%s2304_s22 + $0xcc] sm:$0xf] %vm1511_vm3, %v1919_v8  ;;  %v1147_v16 = vadd.f32 %v2290_v17, %v1078_v9  ;;  %v1079_v19 = vmul.f32 %v2285_v15, %v881_v13  ;;  %v1111_v20 = vmul.f32 %v2285_v15, %v1009_v14  ;;  %v883_v21 = vpop.f32.mrb[43].mxu0  ;;  %v1011_v22 = vpop.f32.mrb[43].mxu1 }
 0x156   : > { %v1179_v18 = vadd.f32 %v2290_v17, %v1110_v10 }
 0x157   : > { %v1211_v23 = vmax.f32 %v1147_v16, 0.0  ;;  %v1148_v25 = vadd.f32 %v2290_v17, %v1079_v19  ;;  %v1180_v26 = vadd.f32 %v2290_v17, %v1111_v20 }
 0x158   : > { %v1243_v24 = vmax.f32 %v1179_v18, 0.0 }
 0x159   : > { %v1888_v27 = vpack.c.bf16 %v1211_v23, %v1211_v23  ;;  %v1212_v29 = vmax.f32 %v1148_v25, 0.0  ;;  %v1244_v30 = vmax.f32 %v1180_v26, 0.0 }
 0x15a   : > { %v1920_v28 = vpack.c.bf16 %v1243_v24, %v1243_v24  ;;  %v886_v31 = vpop.f32.mrb[44].mxu0  ;;  %v1014_v32 = vpop.f32.mrb[44].mxu1 }
 0x15b   : > { %1532 = vst.msk [vmem:[%s2304_s22 + $0x50] sm:$0xf] %vm1511_vm3, %v1888_v27  ;;  %v1889_v33 = vpack.c.bf16 %v1212_v29, %v1212_v29  ;;  %v1921_v34 = vpack.c.bf16 %v1244_v30, %v1244_v30  ;;  %v1080_v35 = vmul.f32 %v2285_v15, %v886_v31  ;;  %v1112_v36 = vmul.f32 %v2285_v15, %v1014_v32  ;;  %v888_v37 = vpop.f32.mrb[45].mxu0  ;;  %v1016_v38 = vpop.f32.mrb[45].mxu1 }
 0x15c   : > { %1564 = vst.msk [vmem:[%s2304_s22 + $0xd0] sm:$0xf] %vm1511_vm3, %v1920_v28  ;;  %v889_v39 = vpop.f32.mrb[46].mxu0  ;;  %v1017_v40 = vpop.f32.mrb[46].mxu1 }
 0x15d   : > { %1533 = vst.msk [vmem:[%s2304_s22 + $0x54] sm:$0xf] %vm1511_vm3, %v1889_v33  ;;  %1565 = vst.msk [vmem:[%s2304_s22 + $0xd4] sm:$0xf] %vm1511_vm3, %v1921_v34  ;;  %v1149_v41 = vadd.f32 %v2290_v17, %v1080_v35  ;;  %v1181_v42 = vadd.f32 %v2290_v17, %v1112_v36  ;;  %v1081_v43 = vmul.f32 %v2285_v15, %v889_v39  ;;  %v891_v45 = vpop.f32.mrb[47].mxu0  ;;  %v1019_v46 = vpop.f32.mrb[47].mxu1 }
 0x15e   : > { %v1113_v44 = vmul.f32 %v2285_v15, %v1017_v40 }
 0x15f   : > { %v1213_v47 = vmax.f32 %v1149_v41, 0.0  ;;  %v1245_v48 = vmax.f32 %v1181_v42, 0.0  ;;  %v1150_v49 = vadd.f32 %v2290_v17, %v1081_v43 }
 0x160   : > { %v1182_v50 = vadd.f32 %v2290_v17, %v1113_v44 }
 0x161   : > { %v1890_v51 = vpack.c.bf16 %v1213_v47, %v1213_v47  ;;  %v1922_v52 = vpack.c.bf16 %v1245_v48, %v1245_v48  ;;  %v1214_v53 = vmax.f32 %v1150_v49, 0.0 }
 0x162   : > { %v1246_v54 = vmax.f32 %v1182_v50, 0.0  ;;  %v894_v55 = vpop.f32.mrb[48].mxu0  ;;  %v1022_v56 = vpop.f32.mrb[48].mxu1 }
 0x163   : > { %1534 = vst.msk [vmem:[%s2304_s22 + $0x58] sm:$0xf] %vm1511_vm3, %v1890_v51  ;;  %1566 = vst.msk [vmem:[%s2304_s22 + $0xd8] sm:$0xf] %vm1511_vm3, %v1922_v52  ;;  %v1891_v57 = vpack.c.bf16 %v1214_v53, %v1214_v53  ;;  %v1082_v59 = vmul.f32 %v2285_v15, %v894_v55  ;;  %v1114_v60 = vmul.f32 %v2285_v15, %v1022_v56  ;;  %v896_v61 = vpop.f32.mrb[49].mxu0  ;;  %v1024_v62 = vpop.f32.mrb[49].mxu1 }
 0x164   : > { %v1923_v58 = vpack.c.bf16 %v1246_v54, %v1246_v54  ;;  %v897_v63 = vpop.f32.mrb[50].mxu0  ;;  %v1025_v0 = vpop.f32.mrb[50].mxu1 }
 0x165   : > { %1535 = vst.msk [vmem:[%s2304_s22 + $0x5c] sm:$0xf] %vm1511_vm3, %v1891_v57  ;;  %v1151_v1 = vadd.f32 %v2290_v17, %v1082_v59  ;;  %v1183_v2 = vadd.f32 %v2290_v17, %v1114_v60  ;;  %v1083_v3 = vmul.f32 %v2285_v15, %v897_v63  ;;  %v1115_v4 = vmul.f32 %v2285_v15, %v1025_v0  ;;  %v899_v5 = vpop.f32.mrb[51].mxu0  ;;  %v1027_v6 = vpop.f32.mrb[51].mxu1 }
 0x166   : > { %1567 = vst.msk [vmem:[%s2304_s22 + $0xdc] sm:$0xf] %vm1511_vm3, %v1923_v58 }
 0x167   : > { %v1215_v7 = vmax.f32 %v1151_v1, 0.0  ;;  %v1247_v8 = vmax.f32 %v1183_v2, 0.0  ;;  %v1152_v9 = vadd.f32 %v2290_v17, %v1083_v3  ;;  %v1184_v10 = vadd.f32 %v2290_v17, %v1115_v4 }
 0x169   : > { %v1892_v11 = vpack.c.bf16 %v1215_v7, %v1215_v7  ;;  %v1924_v12 = vpack.c.bf16 %v1247_v8, %v1247_v8  ;;  %v1216_v13 = vmax.f32 %v1152_v9, 0.0  ;;  %v1248_v14 = vmax.f32 %v1184_v10, 0.0 }
 0x16a   : > { %v902_v16 = vpop.f32.mrb[52].mxu0  ;;  %v1030_v18 = vpop.f32.mrb[52].mxu1 }
 0x16b   : > { %1536 = vst.msk [vmem:[%s2304_s22 + $0x60] sm:$0xf] %vm1511_vm3, %v1892_v11  ;;  %1568 = vst.msk [vmem:[%s2304_s22 + $0xe0] sm:$0xf] %vm1511_vm3, %v1924_v12  ;;  %v1893_v19 = vpack.c.bf16 %v1216_v13, %v1216_v13  ;;  %v1925_v20 = vpack.c.bf16 %v1248_v14, %v1248_v14  ;;  %v1084_v21 = vmul.f32 %v2285_v15, %v902_v16  ;;  %v904_v23 = vpop.f32.mrb[53].mxu0  ;;  %v1032_v24 = vpop.f32.mrb[53].mxu1 }
 0x16c   : > { %v1116_v22 = vmul.f32 %v2285_v15, %v1030_v18  ;;  %v905_v25 = vpop.f32.mrb[54].mxu0  ;;  %v1033_v26 = vpop.f32.mrb[54].mxu1 }
 0x16d   : > { %1537 = vst.msk [vmem:[%s2304_s22 + $0x64] sm:$0xf] %vm1511_vm3, %v1893_v19  ;;  %1569 = vst.msk [vmem:[%s2304_s22 + $0xe4] sm:$0xf] %vm1511_vm3, %v1925_v20  ;;  %v1153_v27 = vadd.f32 %v2290_v17, %v1084_v21  ;;  %v1085_v29 = vmul.f32 %v2285_v15, %v905_v25  ;;  %v1117_v30 = vmul.f32 %v2285_v15, %v1033_v26  ;;  %v907_v31 = vpop.f32.mrb[55].mxu0  ;;  %v1035_v32 = vpop.f32.mrb[55].mxu1 }
 0x16e   : > { %v1185_v28 = vadd.f32 %v2290_v17, %v1116_v22 }
 0x16f   : > { %v1217_v33 = vmax.f32 %v1153_v27, 0.0  ;;  %v1154_v35 = vadd.f32 %v2290_v17, %v1085_v29  ;;  %v1186_v36 = vadd.f32 %v2290_v17, %v1117_v30 }
 0x170   : > { %v1249_v34 = vmax.f32 %v1185_v28, 0.0 }
 0x171   : > { %v1894_v37 = vpack.c.bf16 %v1217_v33, %v1217_v33  ;;  %v1218_v39 = vmax.f32 %v1154_v35, 0.0  ;;  %v1250_v40 = vmax.f32 %v1186_v36, 0.0 }
 0x172   : > { %v1926_v38 = vpack.c.bf16 %v1249_v34, %v1249_v34  ;;  %v910_v41 = vpop.f32.mrb[56].mxu0  ;;  %v1038_v42 = vpop.f32.mrb[56].mxu1 }
 0x173   : > { %1538 = vst.msk [vmem:[%s2304_s22 + $0x68] sm:$0xf] %vm1511_vm3, %v1894_v37  ;;  %v1895_v43 = vpack.c.bf16 %v1218_v39, %v1218_v39  ;;  %v1927_v44 = vpack.c.bf16 %v1250_v40, %v1250_v40  ;;  %v1086_v45 = vmul.f32 %v2285_v15, %v910_v41  ;;  %v1118_v46 = vmul.f32 %v2285_v15, %v1038_v42  ;;  %v912_v47 = vpop.f32.mrb[57].mxu0  ;;  %v1040_v48 = vpop.f32.mrb[57].mxu1 }
 0x174   : > { %1570 = vst.msk [vmem:[%s2304_s22 + $0xe8] sm:$0xf] %vm1511_vm3, %v1926_v38  ;;  %v913_v49 = vpop.f32.mrb[58].mxu0  ;;  %v1041_v50 = vpop.f32.mrb[58].mxu1 }
 0x175   : > { %1539 = vst.msk [vmem:[%s2304_s22 + $0x6c] sm:$0xf] %vm1511_vm3, %v1895_v43  ;;  %1571 = vst.msk [vmem:[%s2304_s22 + $0xec] sm:$0xf] %vm1511_vm3, %v1927_v44  ;;  %v1155_v51 = vadd.f32 %v2290_v17, %v1086_v45  ;;  %v1187_v52 = vadd.f32 %v2290_v17, %v1118_v46  ;;  %v1087_v53 = vmul.f32 %v2285_v15, %v913_v49  ;;  %v915_v55 = vpop.f32.mrb[59].mxu0  ;;  %v1043_v56 = vpop.f32.mrb[59].mxu1 }
 0x176   : > { %v1119_v54 = vmul.f32 %v2285_v15, %v1041_v50 }
 0x177   : > { %v1219_v57 = vmax.f32 %v1155_v51, 0.0  ;;  %v1251_v58 = vmax.f32 %v1187_v52, 0.0  ;;  %v1156_v59 = vadd.f32 %v2290_v17, %v1087_v53 }
 0x178   : > { %v1188_v60 = vadd.f32 %v2290_v17, %v1119_v54 }
 0x179   : > { %v1896_v61 = vpack.c.bf16 %v1219_v57, %v1219_v57  ;;  %v1928_v62 = vpack.c.bf16 %v1251_v58, %v1251_v58  ;;  %v1220_v63 = vmax.f32 %v1156_v59, 0.0 }
 0x17a   : > { %v1252_v0 = vmax.f32 %v1188_v60, 0.0  ;;  %v918_v1 = vpop.f32.mrb[60].mxu0  ;;  %v1046_v2 = vpop.f32.mrb[60].mxu1 }
 0x17b   : > { %1540 = vst.msk [vmem:[%s2304_s22 + $0x70] sm:$0xf] %vm1511_vm3, %v1896_v61  ;;  %1572 = vst.msk [vmem:[%s2304_s22 + $0xf0] sm:$0xf] %vm1511_vm3, %v1928_v62  ;;  %v1897_v3 = vpack.c.bf16 %v1220_v63, %v1220_v63  ;;  %v1088_v5 = vmul.f32 %v2285_v15, %v918_v1  ;;  %v1120_v6 = vmul.f32 %v2285_v15, %v1046_v2  ;;  %v920_v7 = vpop.f32.mrb[61].mxu0  ;;  %v1048_v8 = vpop.f32.mrb[61].mxu1 }
 0x17c   : > { %v1929_v4 = vpack.c.bf16 %v1252_v0, %v1252_v0  ;;  %v921_v9 = vpop.f32.mrb[62].mxu0  ;;  %v1049_v10 = vpop.f32.mrb[62].mxu1 }
 0x17d   : > { %1541 = vst.msk [vmem:[%s2304_s22 + $0x74] sm:$0xf] %vm1511_vm3, %v1897_v3  ;;  %v1157_v11 = vadd.f32 %v2290_v17, %v1088_v5  ;;  %v1189_v12 = vadd.f32 %v2290_v17, %v1120_v6  ;;  %v1089_v13 = vmul.f32 %v2285_v15, %v921_v9  ;;  %v1121_v14 = vmul.f32 %v2285_v15, %v1049_v10  ;;  %v923_v16 = vpop.f32.mrb[63].mxu0  ;;  %v1051_v18 = vpop.f32.mrb[63].mxu1 }
 0x17e   : > { %1573 = vst.msk [vmem:[%s2304_s22 + $0xf4] sm:$0xf] %vm1511_vm3, %v1929_v4 }
 0x17f   : > { %v1221_v19 = vmax.f32 %v1157_v11, 0.0  ;;  %v1253_v20 = vmax.f32 %v1189_v12, 0.0  ;;  %v1158_v21 = vadd.f32 %v2290_v17, %v1089_v13  ;;  %v1190_v22 = vadd.f32 %v2290_v17, %v1121_v14 }
 0x181   : > { %v1898_v23 = vpack.c.bf16 %v1221_v19, %v1221_v19  ;;  %v1930_v24 = vpack.c.bf16 %v1253_v20, %v1253_v20  ;;  %v1222_v25 = vmax.f32 %v1158_v21, 0.0  ;;  %v1254_v26 = vmax.f32 %v1190_v22, 0.0 }
 0x183   : > { %1542 = vst.msk [vmem:[%s2304_s22 + $0x78] sm:$0xf] %vm1511_vm3, %v1898_v23  ;;  %1574 = vst.msk [vmem:[%s2304_s22 + $0xf8] sm:$0xf] %vm1511_vm3, %v1930_v24  ;;  %v1899_v27 = vpack.c.bf16 %v1222_v25, %v1222_v25  ;;  %v1931_v28 = vpack.c.bf16 %v1254_v26, %v1254_v26 }
 0x185   : > { %1543 = vst.msk [vmem:[%s2304_s22 + $0x7c] sm:$0xf] %vm1511_vm3, %v1899_v27  ;;  %1575 = vst.msk [vmem:[%s2304_s22 + $0xfc] sm:$0xf] %vm1511_vm3, %v1931_v28 }
 0x186 PF: > { %s13_s14 = sadd.s32 1, %s2106_s14   ;;  %s2567_s12 = smov %s2102_s13 }
 0x187   : > { %p10_p5 = scmp.ge.s32.totalorder %s13_s14, 6   ;;  %s2568_s13 = smov %s2570_s15 }
 0x189   :  { %12 = sbr.rel (!%p10_p5) target bundleno = 2 (0x2), region = 68 }

</bundles_post_ra>
